<compile_context>
chip_gen: v7x
topology: tpu7x:2x2x1
jax: 0.10.0
libtpu: 0.0.40
codegen_flags: <defaults>
</compile_context>

<pallas_src>
import functools

import jax
import jax.numpy as jnp
from jax import lax
from jax.experimental import pallas as pl
from jax.experimental.pallas import tpu as pltpu


HIDDEN = 32
IN_F = 2
OUT_F = 1
LANE = 128
STRIP = 256          # lanes per fused layer1->ReLU->layer2 strip (h = 8 vregs)
TN_DEFAULT = 65536   # default batch-lane tile (>= 32K per review)
TN_MAX = 262144      # hard cap so VMEM stays well inside v7x's 64 MiB


def _cdiv(a, b):
    return -(-a // b)


def _round_up(a, m):
    return _cdiv(a, m) * m


def dvn_kernel(x_ref, w1_ref, b1_ref, w2t_ref, b2_ref, o_ref, *, strip, n_strips):
    # x_ref  : (IN_F, TN)     -- batch on lanes (lane-dense)
    # w1_ref : (HIDDEN, IN_F)
    # b1_ref : (HIDDEN, 1)
    # w2t_ref: (OUT_F, HIDDEN)
    # b2_ref : (OUT_F, 1)
    # o_ref  : (OUT_F, TN)
    w1 = w1_ref[...]
    w2t = w2t_ref[...]
    # Hoist the bias broadcasts out of the strip loop (JAX does not CSE
    # broadcast_in_dim; per-iteration broadcasts would be re-emitted).
    b1b = jnp.broadcast_to(b1_ref[...], (HIDDEN, strip))
    b2b = jnp.broadcast_to(b2_ref[...], (OUT_F, strip))

    def body(s, carry):
        off = pl.multiple_of(s * strip, strip)          # lane-aligned (>=128)
        xs = x_ref[:, pl.ds(off, strip)]                # (IN_F, strip)
        # Layer 1 on the MXU (M=32, K=2, N=strip); h stays in vregs.
        h = jnp.dot(w1, xs, preferred_element_type=jnp.float32) + b1b
        h = jnp.maximum(h, 0.0)                         # VPU ReLU
        # Layer 2 on the MXU (M=1, K=32, N=strip).
        y = jnp.dot(w2t, h, preferred_element_type=jnp.float32) + b2b
        o_ref[:, pl.ds(off, strip)] = y.astype(o_ref.dtype)
        return carry

    lax.fori_loop(0, n_strips, body, 0, unroll=min(8, n_strips))


def _choose_tile(n, tn):
    """Pick (tn_eff, n_pad): lane tile and padded batch size."""
    n_al = _round_up(max(n, 1), LANE)
    # Aim for >=2 grid steps so ("parallel",) shards across v7x's two
    # TensorCores; cap the tile at `tn` to bound VMEM (v7x has only 64 MiB).
    steps = max(2, _cdiv(n_al, tn))
    tn_eff = _round_up(_cdiv(n_al, steps), STRIP)
    n_pad = _round_up(max(n, 1), tn_eff)
    return tn_eff, n_pad


def _dvn_pallas(xt, w1, b1, w2t, b2, tn_eff):
    """xt: (IN_F, n_pad) with n_pad % tn_eff == 0. Returns (OUT_F, n_pad)."""
    n_pad = xt.shape[1]
    assert n_pad % tn_eff == 0 and tn_eff % STRIP == 0
    grid = (n_pad // tn_eff,)
    kernel = functools.partial(dvn_kernel, strip=STRIP, n_strips=tn_eff // STRIP)

    cost = pl.CostEstimate(
        flops=(2 * IN_F * HIDDEN + 2 * HIDDEN * OUT_F + HIDDEN) * n_pad,
        transcendentals=0,
        bytes_accessed=4 * ((IN_F + OUT_F) * n_pad
                            + HIDDEN * IN_F + HIDDEN + HIDDEN * OUT_F + OUT_F),
    )

    return pl.pallas_call(
        kernel,
        out_shape=jax.ShapeDtypeStruct((OUT_F, n_pad), jnp.float32),
        grid_spec=pltpu.PrefetchScalarGridSpec(
            num_scalar_prefetch=0,
            grid=grid,
            in_specs=[
                pl.BlockSpec((IN_F, tn_eff), lambda i: (0, i)),    # x tile (lane-dense)
                pl.BlockSpec((HIDDEN, IN_F), lambda i: (0, 0)),    # W1 (resident)
                pl.BlockSpec((HIDDEN, 1), lambda i: (0, 0)),       # b1 (resident)
                pl.BlockSpec((OUT_F, HIDDEN), lambda i: (0, 0)),   # W2 (resident)
                pl.BlockSpec((OUT_F, 1), lambda i: (0, 0)),        # b2 (resident)
            ],
            out_specs=pl.BlockSpec((OUT_F, tn_eff), lambda i: (0, i)),
        ),
        compiler_params=pltpu.CompilerParams(
            dimension_semantics=("parallel",),
            vmem_limit_bytes=48 * 1024 * 1024,
        ),
        cost_estimate=cost,
    )(xt, w1, b1, w2t, b2)


@functools.partial(jax.jit, static_argnames=("tn",))
def dvn_forward_fm(xt, w1, b1, w2t, b2, *, tn=TN_DEFAULT):
    """Feature-major fast path: xt (2, N) float32 -> (1, N) float32.

    Avoids the wrapper transpose / full-array re-pad / reshape passes: only the
    tail tile is zero-padded, and only the valid lanes are sliced back out.
    Producers that can supply (2, N) data should call this directly.
    """
    assert xt.shape[0] == IN_F
    assert tn % STRIP == 0 and STRIP <= tn <= TN_MAX
    n = xt.shape[1]
    tn_eff, n_pad = _choose_tile(n, tn)
    if n_pad != n:
        xt = jnp.pad(xt, ((0, 0), (0, n_pad - n)))     # tail tile only
    out = _dvn_pallas(xt, w1, b1, w2t, b2, tn_eff)     # (1, n_pad)
    return out if n_pad == n else out[:, :n]


@functools.partial(jax.jit, static_argnames=("tn",))
def dvn_forward(x, w1, b1, w2t, b2, *, tn=TN_DEFAULT):
    """PyTorch-layout compat path: x (N, 2) -> (N, 1).

    NOTE: the x.T / final reshape here cost an extra HBM pass outside the
    kernel; prefer dvn_forward_fm when the producer can emit (2, N) data.
    """
    n = x.shape[0]
    y = dvn_forward_fm(x.T, w1, b1, w2t, b2, tn=tn)    # (1, n)
    # (1, n) row-major has the same element order as (n, 1): cheap reshape.
    return y.reshape(n, OUT_F)


def init_params(key):
    """Deterministic init matching nn.Linear(2,32) / nn.Linear(32,1) shapes."""
    k1, k2, k3, k4 = jax.random.split(key, 4)
    bound1 = 1.0 / jnp.sqrt(IN_F)
    bound2 = 1.0 / jnp.sqrt(HIDDEN)
    w1 = jax.random.uniform(k1, (HIDDEN, IN_F), jnp.float32, -bound1, bound1)
    b1 = jax.random.uniform(k2, (HIDDEN, 1), jnp.float32, -bound1, bound1)
    w2t = jax.random.uniform(k3, (OUT_F, HIDDEN), jnp.float32, -bound2, bound2)
    b2 = jax.random.uniform(k4, (OUT_F, 1), jnp.float32, -bound2, bound2)
    return w1, b1, w2t, b2


def _ref_forward(x, w1, b1, w2t, b2):
    h = jnp.maximum(x @ w1.T + b1.T, 0.0)              # (N, 32)
    return h @ w2t.T + b2.T                            # (N, 1)


if __name__ == "__main__":
    key = jax.random.PRNGKey(0)
    kx, kp = jax.random.split(key)
    w1, b1, w2t, b2 = init_params(kp)

    # 1) Tiny batch through the PyTorch-layout compat wrapper.
    x = jax.random.normal(kx, (8, IN_F), dtype=jnp.float32)
    y = dvn_forward(x, w1, b1, w2t, b2)
    jax.block_until_ready(y)
    ref = _ref_forward(x, w1, b1, w2t, b2)
    assert y.shape == (8, OUT_F)
    assert jnp.allclose(y, ref, atol=1e-4, rtol=1e-4)

    # 2) Feature-major fast path: aligned batch, >=2 grid steps (v7x megacore).
    xt = jax.random.normal(kx, (IN_F, 512), dtype=jnp.float32)
    yt = dvn_forward_fm(xt, w1, b1, w2t, b2)
    jax.block_until_ready(yt)
    reft = _ref_forward(xt.T, w1, b1, w2t, b2).T       # (1, 512)
    assert yt.shape == (OUT_F, 512)
    assert jnp.allclose(yt, reft, atol=1e-4, rtol=1e-4)

    # 3) Multi-step grid + multi-strip tiles + ragged tail (small tile override).
    x2 = jax.random.normal(kx, (3000, IN_F), dtype=jnp.float32)
    y2 = dvn_forward(x2, w1, b1, w2t, b2, tn=1024)
    jax.block_until_ready(y2)
    ref2 = _ref_forward(x2, w1, b1, w2t, b2)
    assert y2.shape == (3000, OUT_F)
    assert jnp.allclose(y2, ref2, atol=1e-4, rtol=1e-4)

    print("KERNEL_OK")
</pallas_src>

<mosaic_0001>
module attributes {stable_mosaic.version = 11 : i64} {
  func.func @dvn_kernel(%arg0: i32, %arg1: memref<2x256xf32, #tpu.memory_space<vmem>>, %arg2: memref<32x2xf32, #tpu.memory_space<vmem>>, %arg3: memref<32x1xf32, #tpu.memory_space<vmem>>, %arg4: memref<1x32xf32, #tpu.memory_space<vmem>>, %arg5: memref<1x1xf32, #tpu.memory_space<vmem>>, %arg6: memref<1x256xf32, #tpu.memory_space<vmem>>) attributes {dimension_semantics = [#tpu.dimension_semantics<parallel>], iteration_bounds = array<i64: 1>, scalar_prefetch = 0 : i64, scratch_operands = 0 : i64, tpu.core_type = #tpu.core_type<tc>, window_params = [{transform_indices = @transform_0, window_bounds = array<i64: 2, 256>}, {pipeline_mode = #tpu.pipeline_mode<synchronous>, transform_indices = @transform_1, window_bounds = array<i64: 32, 2>}, {pipeline_mode = #tpu.pipeline_mode<synchronous>, transform_indices = @transform_2, window_bounds = array<i64: 32, 1>}, {pipeline_mode = #tpu.pipeline_mode<synchronous>, transform_indices = @transform_3, window_bounds = array<i64: 1, 32>}, {pipeline_mode = #tpu.pipeline_mode<synchronous>, transform_indices = @transform_4, window_bounds = array<i64: 1, 1>}, {transform_indices = @transform_5, window_bounds = array<i64: 1, 256>}]} {
    %c0 = arith.constant 0 : index
    %c0_0 = arith.constant 0 : index
    %0 = vector.load %arg2[%c0, %c0_0] : memref<32x2xf32, #tpu.memory_space<vmem>>, vector<32x2xf32>
    %c0_1 = arith.constant 0 : index
    %c0_2 = arith.constant 0 : index
    %1 = vector.load %arg4[%c0_1, %c0_2] : memref<1x32xf32, #tpu.memory_space<vmem>>, vector<1x32xf32>
    %c0_3 = arith.constant 0 : index
    %c0_4 = arith.constant 0 : index
    %2 = vector.load %arg3[%c0_3, %c0_4] : memref<32x1xf32, #tpu.memory_space<vmem>>, vector<32x1xf32>
    %3 = vector.shape_cast %2 : vector<32x1xf32> to vector<32x1xf32>
    %4 = vector.broadcast %3 : vector<32x1xf32> to vector<32x256xf32>
    %c0_5 = arith.constant 0 : index
    %c0_6 = arith.constant 0 : index
    %5 = vector.load %arg5[%c0_5, %c0_6] : memref<1x1xf32, #tpu.memory_space<vmem>>, vector<1x1xf32>
    %6 = vector.shape_cast %5 : vector<1x1xf32> to vector<1x1xf32>
    %7 = vector.broadcast %6 : vector<1x1xf32> to vector<1x256xf32>
    %c0_i32 = arith.constant 0 : i32
    %c256_i32 = arith.constant 256 : i32
    %8 = arith.muli %c0_i32, %c256_i32 : i32
    %9 = tpu.assume_multiple %8, 256 : i32
    %c0_7 = arith.constant 0 : index
    %10 = arith.index_cast %9 : i32 to index
    %11 = vector.load %arg1[%c0_7, %10] : memref<2x256xf32, #tpu.memory_space<vmem>>, vector<2x256xf32>
    %cst = arith.constant dense<0.000000e+00> : vector<32x256xf32>
    %12 = tpu.matmul %0, %11, %cst {dimension_numbers = #tpu.dot_dimension_numbers<[1], [0], [0], [1], [0, 0, 1, 1], [], []>} : vector<32x2xf32>, vector<2x256xf32>, vector<32x256xf32> -> vector<32x256xf32>
    %13 = arith.addf %12, %4 : vector<32x256xf32>
    %cst_8 = arith.constant 0.000000e+00 : f32
    %14 = vector.broadcast %cst_8 : f32 to vector<32x256xf32>
    %15 = arith.maximumf %13, %14 : vector<32x256xf32>
    %cst_9 = arith.constant dense<0.000000e+00> : vector<1x256xf32>
    %16 = tpu.matmul %1, %15, %cst_9 {dimension_numbers = #tpu.dot_dimension_numbers<[1], [0], [0], [1], [0, 0, 1, 1], [], []>} : vector<1x32xf32>, vector<32x256xf32>, vector<1x256xf32> -> vector<1x256xf32>
    %17 = arith.addf %16, %7 : vector<1x256xf32>
    %c0_10 = arith.constant 0 : index
    %18 = arith.index_cast %9 : i32 to index
    %19 = vector.load %arg6[%c0_10, %18] : memref<1x256xf32, #tpu.memory_space<vmem>>, vector<1x256xf32>
    tpu.vector_store %arg6[%c0_10, %18], %17 {strides = array<i32>} : memref<1x256xf32, #tpu.memory_space<vmem>>, vector<1x256xf32>,
    %c1_i32 = arith.constant 1 : i32
    return
  }
  func.func @transform_0(%arg0: i32) -> (i32, i32) {
    %c0_i32 = arith.constant 0 : i32
    %c0_i32_0 = arith.constant 0 : i32
    return %c0_i32, %arg0 : i32, i32
  }
  func.func @transform_1(%arg0: i32) -> (i32, i32) {
    %c0_i32 = arith.constant 0 : i32
    %c0_i32_0 = arith.constant 0 : i32
    %c0_i32_1 = arith.constant 0 : i32
    return %c0_i32, %c0_i32_0 : i32, i32
  }
  func.func @transform_2(%arg0: i32) -> (i32, i32) {
    %c0_i32 = arith.constant 0 : i32
    %c0_i32_0 = arith.constant 0 : i32
    %c0_i32_1 = arith.constant 0 : i32
    return %c0_i32, %c0_i32_0 : i32, i32
  }
  func.func @transform_3(%arg0: i32) -> (i32, i32) {
    %c0_i32 = arith.constant 0 : i32
    %c0_i32_0 = arith.constant 0 : i32
    %c0_i32_1 = arith.constant 0 : i32
    return %c0_i32, %c0_i32_0 : i32, i32
  }
  func.func @transform_4(%arg0: i32) -> (i32, i32) {
    %c0_i32 = arith.constant 0 : i32
    %c0_i32_0 = arith.constant 0 : i32
    %c0_i32_1 = arith.constant 0 : i32
    return %c0_i32, %c0_i32_0 : i32, i32
  }
  func.func @transform_5(%arg0: i32) -> (i32, i32) {
    %c0_i32 = arith.constant 0 : i32
    %c0_i32_0 = arith.constant 0 : i32
    return %c0_i32, %arg0 : i32, i32
  }
}

</mosaic_0001>

<bundles_post_ra>
// kernel: dvn_forward_fm.1
= control target key start
LH: loop header
LB: loop body
LE: loop exit
PB: predicated region body
PF: predicated region fallthrough
CT: control target
= control target key end

     0   :  { %vm84_vm0 = vcmask 1041408   ;;  %v309_v1 = vmov 0.0   ;;  %v310_v2 = vmov 0   ;;  %vm71_vm1 = vcmask 15360   ;;  %s384_s0 = inlined_call_operand.vmem [shape: f32[2,256], index: 0, kind: input, shape index: {}]   ;;  %s385_s1 = inlined_call_operand.vmem [shape: f32[32,2], index: 1, kind: input, shape index: {}]   ;;  %s386_s2 = inlined_call_operand.vmem [shape: f32[32,1], index: 2, kind: input, shape index: {}]   ;;  %s387_s4 = inlined_call_operand.<no memory space> [shape: f32[1,1], index: 4, kind: input, shape index: {}]   ;;  %s388_s3 = inlined_call_operand.vmem [shape: f32[1,32], index: 3, kind: input, shape index: {}]   ;;  %s389_s5 = inlined_call_operand.vmem [shape: f32[1,256], index: 5, kind: output, shape index: {}]  }
   0x1   :  { %v288_v0 = vld.sshfl [vmem:[%s384_s0] sm:$0x33 pattern:$0x76325410]  ;;  %153 = vmatprep.mubr.f32.mxu0 %v309_v1  ;;  %307 = vset.pattern.permute.xlu0 %v310_v2  ;;  %v10_v3 = vstv %s387_s4  ;;  %v29_v7 = vld [vmem:[%s386_s2 + $0x10] sm:$0xff]  ;;  %v28_v8 = vld [vmem:[%s386_s2 + $0x8] sm:$0xff]  ;;  %v57_v47 = vlaneseq }
   0x2   :  { %v70_v4 = vcombine.high %v288_v0, %v288_v0  ;;  %v27_v5 = vld [vmem:[%s386_s2] sm:$0xff]  ;;  %308 = vset.pattern.permute.xlu1 %v310_v2  ;;  %11 = vst [vmem:[#allocation2] sm:$0x1] %v10_v3  ;;  %254 = vmatprep.mubr.f32.mxu1 %v309_v1  ;;  %v30_v9 = vld [vmem:[%s386_s2 + $0x18] sm:$0xff]  ;;  %v23_v10 = vld [vmem:[%s385_s1 + $0x8] sm:$0xff]  ;;  %vm186_vm2 = vcmask 261120  }
   0x3   :  { %v22_v6 = vld [vmem:[%s385_s1] sm:$0xff]  ;;  %33 = vperm.xlu0 %307, %v27_v5   ;;  %43 = vperm.xlu1 %308, %v29_v7   ;;  %v24_v12 = vld [vmem:[%s385_s1 + $0x10] sm:$0xff]  ;;  %v25_v13 = vld [vmem:[%s385_s1 + $0x18] sm:$0xff]  ;;  %v58_v48 = vshrl.u32 %v57_v47, 7  ;;  %v311_v49 = vmov 1966171168  }
   0x4   :  { %289 = vmatprep.subr.msk.mxu0 %vm84_vm0, %v70_v4  ;;  %v26_v46 = vld [vmem:[%s388_s3] sm:$0x1]  ;;  %v265_v50 = vunpack.c.l.s4 %v311_v49  ;;  %vm281_vm3 = vcmp.lt.s32.totalorder %v57_v47, 256 }
   0x5   :  { %290 = vmatpush1.msk.msra.mxu0 %vm84_vm0, %v288_v0  ;;  %v59_v51 = vsub.s32 0, %v58_v48 }
   0x6   :  { %291 = vmatmul.mubr.msk.f32.vlgmr.msra.gmra.mrb[0].mxu0 %vm71_vm1, %v22_v6  ;;  %v266_v53 = vunpack.c.0.s8 %v265_v50 }
   0x7   :  { %159 = vmatprep.mubr.f32.mxu0 %v309_v1  ;;  %38 = vperm.xlu0 %307, %v28_v8  }
   0x8   :  { %48 = vperm.xlu1 %308, %v30_v9   ;;  %v269_v59 = vsub.s32 %v266_v53, %v58_v48 }
   0x9   :  { %v51_v11 = vld [vmem:[#allocation2] sm:$0x1] }
   0xa   :  { %292 = vmatmul.mubr.msk.f32.gmra.mrb[2].mxu0 %vm71_vm1, %v23_v10 }
   0xb   :  { %165 = vmatprep.mubr.f32.mxu0 %v309_v1  ;;  %54 = vperm.xlu0 %307, %v51_v11  }
   0xe   :  { %293 = vmatmul.mubr.msk.f32.gmra.mrb[4].mxu0 %vm71_vm1, %v24_v12 }
   0xf   :  { %171 = vmatprep.mubr.f32.mxu0 %v309_v1 }
  0x12   :  { %294 = vmatmul.mubr.msk.f32.gmra.mrb[6].mxu0 %vm71_vm1, %v25_v13 }
  0x82   :  { %v34_v14 = vpop.permute.xlu0 %33  ;;  %v44_v23 = vpop.permute.xlu1 %43 }
  0x86   :  { %v39_v18 = vpop.permute.xlu0 %38 }
  0x87   :  { %v49_v34 = vpop.permute.xlu1 %48 }
  0x8a   :  { %v55_v52 = vpop.permute.xlu0 %54 }
  0x8b   :  { %v60_v54 = vrot.slane %v55_v52, %v59_v51 }
  0xd9   :  { %v155_v15 = vpop.f32.mrb[0].mxu0 }
  0xda   :  { %v157_v16 = vpop.f32.mrb[1].mxu0  ;;  %v156_v17 = vadd.f32 %v155_v15, %v34_v14 }
  0xdb   :  { %v158_v19 = vadd.f32 %v157_v16, %v34_v14 }
  0xdc   :  { %v178_v25 = vmax.f32 %v156_v17, 0.0 }
  0xdd   :  { %v161_v20 = vpop.f32.mrb[2].mxu0  ;;  %v179_v27 = vmax.f32 %v158_v19, 0.0 }
  0xde   :  { %v162_v21 = vadd.f32 %v161_v20, %v39_v18  ;;  %v163_v22 = vpop.f32.mrb[3].mxu0 }
  0xdf   :  { %v164_v24 = vadd.f32 %v163_v22, %v39_v18 }
  0xe0   :  { %v180_v26 = vmax.f32 %v162_v21, 0.0 }
  0xe1   :  { %v181_v28 = vmax.f32 %v164_v24, 0.0  ;;  %v167_v29 = vpop.f32.mrb[4].mxu0 }
  0xe2   :  { %v169_v30 = vpop.f32.mrb[5].mxu0  ;;  %v298_v31 = vpack.c.bf16 %v180_v26, %v178_v25  ;;  %v168_v33 = vadd.f32 %v167_v29, %v44_v23 }
  0xe3   :  { %v296_v32 = vpack.c.bf16 %v181_v28, %v179_v27  ;;  %v170_v35 = vadd.f32 %v169_v30, %v44_v23 }
  0xe4   :  { %v182_v40 = vmax.f32 %v168_v33, 0.0 }
  0xe5   :  { %v173_v36 = vpop.f32.mrb[6].mxu0  ;;  %297 = vmatprep.subr.bf16.mxu1 %v296_v32  ;;  %v183_v42 = vmax.f32 %v170_v35, 0.0 }
  0xe6   :  { %v174_v37 = vadd.f32 %v173_v36, %v49_v34  ;;  %v175_v38 = vpop.f32.mrb[7].mxu0  ;;  %299 = vmatpush1.bf16.msra.mxu1 %v298_v31 }
  0xe7   :  { %v176_v39 = vadd.f32 %v175_v38, %v49_v34 }
  0xe8   :  { %v184_v41 = vmax.f32 %v174_v37, 0.0 }
  0xe9   :  { %v185_v43 = vmax.f32 %v176_v39, 0.0 }
  0xea   :  { %v302_v44 = vpack.c.bf16 %v184_v41, %v182_v40 }
  0xeb   :  { %v300_v45 = vpack.c.bf16 %v185_v43, %v183_v42 }
  0xed   :  { %301 = vmatprep.subr.bf16.mxu1 %v300_v45 }
  0xee   :  { %303 = vmatpush1.bf16.msra.mxu1 %v302_v44 }
  0xf1   :  { %295 = vmatmul.mubr.msk.f32.vlgmr.msra.gmra.mrb[0].mxu1 %vm186_vm2, %v26_v46 }
 0x1c4   :  { %v256_v55 = vpop.f32.mrb[0].mxu1 }
 0x1c5   :  { %v257_v56 = vadd.f32 %v256_v55, %v60_v54  ;;  %v258_v57 = vpop.f32.mrb[1].mxu1 }
 0x1c6   :  { %v259_v58 = vadd.f32 %v258_v57, %v60_v54 }
 0x1c8   :  { %v263_v60 = vcombine.low %v257_v56, %v259_v58 }
 0x1ca   :  { %v270_v61 = vrot.slane %v263_v60, %v269_v59 }
 0x1cc   :  { %v277_v62 = vrot.slane %v270_v61, %v269_v59 }
 0x1ce   :  { %283 = vst.msk [vmem:[%s389_s5] sm:$0x3] %vm281_vm3, %v277_v62 }

</bundles_post_ra>
